<compile_context>
chip_gen: v6e
topology: v6e:2x2x1
jax: 0.10.0
libtpu: 0.0.40
codegen_flags: <defaults>
</compile_context>

<pallas_src>
from functools import partial

import jax
import jax.numpy as jnp
from jax.experimental import pallas as pl
from jax.experimental.pallas import tpu as pltpu


def _fill_im2col(x_ref, xcol_ref, *, length, pad):
    """Stage B_blk samples of x into a [K*C_in, B_blk*L] im2col buffer in VMEM.

    Row block k holds the tap-(k) lane-shifted copy of each sample; the at most
    2*pad out-of-range boundary columns per (tap, sample) are zero-filled.
    """
    b_blk, c_in, _ = x_ref.shape
    k_taps = xcol_ref.shape[0] // c_in
    for b in range(b_blk):
        xb = x_ref[b].astype(xcol_ref.dtype)            # [C_in, L], cast once in VMEM
        base = b * length
        for k in range(k_taps):
            s = k - pad                                  # lane shift of this tap
            rows = slice(k * c_in, (k + 1) * c_in)
            if s < 0:
                xcol_ref[rows, base:base - s] = jnp.zeros((c_in, -s), xcol_ref.dtype)
                xcol_ref[rows, base - s:base + length] = xb[:, :length + s]
            elif s > 0:
                xcol_ref[rows, base:base + length - s] = xb[:, s:]
                xcol_ref[rows, base + length - s:base + length] = (
                    jnp.zeros((c_in, s), xcol_ref.dtype))
            else:
                xcol_ref[rows, base:base + length] = xb


def _conv_stats_kernel(x_ref, w_ref, stats_ref, xcol_ref, *, length, pad):
    """Phase 1: conv (no bias) of B_blk samples -> per-block BN partial stats only.

    x_ref:     [B_blk, C_in, L]
    w_ref:     [C_out, K*C_in]   (constant index_map -> VMEM resident)
    stats_ref: [C_out, 2]        per-block [sum, sum_of_squares] over (B_blk, L)
    xcol_ref:  [K*C_in, B_blk*L] im2col scratch (compute dtype)
    """
    _fill_im2col(x_ref, xcol_ref, length=length, pad=pad)
    acc = jnp.dot(w_ref[...], xcol_ref[...],
                  preferred_element_type=jnp.float32)    # [C_out, B_blk*L], one MXU pass
    s0 = jnp.sum(acc, axis=-1, keepdims=True)
    s1 = jnp.sum(acc * acc, axis=-1, keepdims=True)
    stats_ref[...] = jnp.concatenate([s0, s1], axis=1)   # single store per grid step


def _conv_affine_kernel(x_ref, w_ref, scale_ref, shift_ref, o_ref, xcol_ref, *,
                        length, pad, apply_relu):
    """Phase 2: recompute conv, apply per-channel affine (BN or bias) (+ ReLU).

    x_ref:     [B_blk, C_in, L]
    w_ref:     [C_out, K*C_in]
    scale_ref: [C_out, 1] f32
    shift_ref: [C_out, 1] f32
    o_ref:     [B_blk, C_out, L]
    xcol_ref:  [K*C_in, B_blk*L]
    """
    _fill_im2col(x_ref, xcol_ref, length=length, pad=pad)
    acc = jnp.dot(w_ref[...], xcol_ref[...],
                  preferred_element_type=jnp.float32)    # [C_out, B_blk*L]
    z = acc * scale_ref[...] + shift_ref[...]
    if apply_relu:
        z = jnp.maximum(z, 0.0)
    b_blk = o_ref.shape[0]
    for b in range(b_blk):
        o_ref[b] = z[:, b * length:(b + 1) * length].astype(o_ref.dtype)


def conv1d_forward(x, weight_v, weight_g, bias, *,
                   gamma=None, beta=None, eps=1e-5, last=False,
                   compute_dtype=jnp.bfloat16):
    """Forward of the PyTorch Conv1D module.

    x:        [N, C_in, L]
    weight_v: [C_out, C_in, K]   weight_norm 'v'
    weight_g: [C_out]            weight_norm 'g'
    bias:     [C_out]
    Returns   [N, C_out, L] = ReLU(BatchNorm1d(Conv1d(x)))   (Conv1d(x)+bias if last)
    """
    n, c_in, length = x.shape
    c_out, c_in_w, k_taps = weight_v.shape
    assert c_in_w == c_in
    pad = (k_taps - 1) // 2

    if gamma is None:
        gamma = jnp.ones((c_out,), jnp.float32)
    if beta is None:
        beta = jnp.zeros((c_out,), jnp.float32)

    # weight_norm reparameterization in f32: W = g * v / ||v|| (norm over C_in, K),
    # then im2col-major [C_out, K*C_in] LHS: w2d[o, k*C_in + c] = W[o, c, k].
    v32 = weight_v.astype(jnp.float32)
    norm = jnp.sqrt(jnp.sum(v32 * v32, axis=(1, 2), keepdims=True))
    w = weight_g.reshape(c_out, 1, 1).astype(jnp.float32) * v32 / norm
    w2d = jnp.transpose(w, (0, 2, 1)).reshape(c_out, k_taps * c_in).astype(compute_dtype)

    # --- generation-aware VMEM budget & batch-block size ---------------------
    try:
        vmem_phys = int(getattr(pltpu.get_tpu_info(), "vmem_capacity_bytes",
                                64 * 2 ** 20))
    except Exception:
        vmem_phys = 64 * 2 ** 20
    vmem_cap = max(32 * 2 ** 20, (vmem_phys * 5) // 8)   # ~40 MiB v7x, ~80 MiB v5e/v6e

    x_item = jnp.dtype(x.dtype).itemsize
    c_item = jnp.dtype(compute_dtype).itemsize
    o_item = jnp.dtype(x.dtype).itemsize
    w_bytes = c_out * k_taps * c_in * c_item
    per_sample = (c_in * length * x_item              # x block
                  + c_out * length * o_item           # output block
                  + k_taps * c_in * length * c_item   # im2col scratch share
                  + c_out * length * 4)               # f32 accumulator value

    budget = vmem_cap // 2                            # headroom for double buffering
    b_blk = 1
    for cand in range(min(n, 8), 0, -1):
        if n % cand == 0 and 2 * w_bytes + 2 * cand * per_sample <= budget:
            b_blk = cand
            break
    n_blocks = n // b_blk
    vmem_limit = int(min(vmem_cap,
                         max(16 * 2 ** 20,
                             2 * (2 * w_bytes + 2 * b_blk * per_sample))))

    grid_params = pltpu.CompilerParams(
        # Per-block input/output/stats tiles are disjoint -> batch axis is safely
        # parallel (megacore on v7x); partial stats are combined below in JAX.
        dimension_semantics=("parallel",),
        vmem_limit_bytes=vmem_limit,
    )

    x_spec = pl.BlockSpec((b_blk, c_in, length), lambda i: (i, 0, 0))
    # Constant index_map -> weight DMA hoisted, VMEM resident across the grid.
    w_spec = pl.BlockSpec((c_out, k_taps * c_in), lambda i: (0, 0))
    chan_spec = pl.BlockSpec((c_out, 1), lambda i: (0, 0))

    if last:
        # Conv + bias only (no BN/ReLU): reuse the affine kernel with scale=1.
        scale = jnp.ones((c_out, 1), jnp.float32)
        shift = bias.astype(jnp.float32).reshape(c_out, 1)
        apply_relu = False
    else:
        # Phase 1: BN partial statistics only (no HBM conv intermediate at all).
        stats = pl.pallas_call(
            partial(_conv_stats_kernel, length=length, pad=pad),
            out_shape=jax.ShapeDtypeStruct((n_blocks, c_out, 2), jnp.float32),
            grid_spec=pltpu.PrefetchScalarGridSpec(
                num_scalar_prefetch=0,
                grid=(n_blocks,),
                in_specs=[x_spec, w_spec],
                out_specs=pl.BlockSpec((None, c_out, 2), lambda i: (i, 0, 0)),
                scratch_shapes=[pltpu.VMEM((k_taps * c_in, b_blk * length),
                                           compute_dtype)],
            ),
            compiler_params=grid_params,
        )(x, w2d)

        # Combine per-block partials -> training-mode BN scale/shift (O(C_out)).
        count = n * length
        sums = jnp.sum(stats, axis=0)                              # [C_out, 2]
        mean = sums[:, 0] / count
        var = jnp.maximum(sums[:, 1] / count - mean * mean, 0.0)   # biased variance
        inv_std = jax.lax.rsqrt(var + eps)
        scale = (gamma.astype(jnp.float32) * inv_std).reshape(c_out, 1)
        shift = (beta.astype(jnp.float32) - mean * scale[:, 0]).reshape(c_out, 1)
        # Conv bias cancels exactly under training-mode BN -> not applied anywhere.
        apply_relu = True

    out = pl.pallas_call(
        partial(_conv_affine_kernel, length=length, pad=pad, apply_relu=apply_relu),
        out_shape=jax.ShapeDtypeStruct((n, c_out, length), x.dtype),
        grid_spec=pltpu.PrefetchScalarGridSpec(
            num_scalar_prefetch=0,
            grid=(n_blocks,),
            in_specs=[x_spec, w_spec, chan_spec, chan_spec],
            out_specs=pl.BlockSpec((b_blk, c_out, length), lambda i: (i, 0, 0)),
            scratch_shapes=[pltpu.VMEM((k_taps * c_in, b_blk * length),
                                       compute_dtype)],
        ),
        compiler_params=grid_params,
    )(x, w2d, scale, shift)
    return out


def _reference_forward(x, weight_v, weight_g, bias, *, gamma, beta,
                       eps=1e-5, last=False):
    """Plain-JAX reference mirroring the PyTorch module's forward."""
    c_out, _, k_taps = weight_v.shape
    pad = (k_taps - 1) // 2
    v32 = weight_v.astype(jnp.float32)
    norm = jnp.sqrt(jnp.sum(v32 * v32, axis=(1, 2), keepdims=True))
    w = weight_g.reshape(c_out, 1, 1).astype(jnp.float32) * v32 / norm
    y = jax.lax.conv_general_dilated(
        x.astype(jnp.float32), w, window_strides=(1,), padding=[(pad, pad)],
        dimension_numbers=("NCH", "OIH", "NCH"))
    y = y + bias.astype(jnp.float32).reshape(1, c_out, 1)
    if last:
        return y
    mean = jnp.mean(y, axis=(0, 2), keepdims=True)
    var = jnp.mean(jnp.square(y - mean), axis=(0, 2), keepdims=True)
    yhat = (y - mean) * jax.lax.rsqrt(var + eps)
    yhat = yhat * gamma.reshape(1, c_out, 1) + beta.reshape(1, c_out, 1)
    return jnp.maximum(yhat, 0.0)


if __name__ == "__main__":
    key = jax.random.PRNGKey(0)
    k_x, k_v, k_g, k_b = jax.random.split(key, 4)

    # Small shapes consistent with the module: batch=2, n_channels=4,
    # n_kernels=8, sequence length=64, kernel_size=5.
    n, c_in, c_out, length, k_taps = 2, 4, 8, 64, 5

    x = jax.random.normal(k_x, (n, c_in, length), jnp.float32)
    weight_v = jax.random.normal(k_v, (c_out, c_in, k_taps), jnp.float32) * 0.3
    weight_g = jnp.abs(jax.random.normal(k_g, (c_out,), jnp.float32)) + 0.5
    bias = jax.random.normal(k_b, (c_out,), jnp.float32) * 0.1
    gamma = jnp.ones((c_out,), jnp.float32)
    beta = jnp.zeros((c_out,), jnp.float32)

    ref = _reference_forward(x, weight_v, weight_g, bias, gamma=gamma, beta=beta)
    ref_last = _reference_forward(x, weight_v, weight_g, bias, gamma=gamma,
                                  beta=beta, last=True)
    ref = jax.block_until_ready(ref)
    ref_last = jax.block_until_ready(ref_last)

    def _check(out, ref_arr, tol, name):
        out = jax.block_until_ready(out)
        if out.shape != ref_arr.shape or not bool(jnp.all(jnp.isfinite(out))):
            raise SystemExit(f"{name}: kernel produced invalid output")
        err = float(jnp.max(jnp.abs(out.astype(jnp.float32) - ref_arr)))
        if err > tol:
            raise SystemExit(f"{name}: kernel/reference mismatch: max abs err = {err}")

    # Exact-precision path (f32 MXU operands): tight tolerance.
    out_f32 = conv1d_forward(x, weight_v, weight_g, bias, gamma=gamma, beta=beta,
                             compute_dtype=jnp.float32)
    _check(out_f32, ref, 2e-3, "conv+bn+relu (f32)")

    # Default path (bf16 MXU operands, f32 accumulation/stats): bf16 tolerance.
    out_bf16 = conv1d_forward(x, weight_v, weight_g, bias, gamma=gamma, beta=beta)
    _check(out_bf16, ref, 5e-2, "conv+bn+relu (bf16)")

    # last=True path: conv + bias only.
    out_last = conv1d_forward(x, weight_v, weight_g, bias, last=True,
                              compute_dtype=jnp.float32)
    _check(out_last, ref_last, 2e-3, "conv only (last=True)")

    print("KERNEL_OK")
</pallas_src>

<mosaic_0001>
module attributes {stable_mosaic.version = 11 : i64} {
  func.func @_conv_stats_kernel(%arg0: i32, %arg1: memref<2x4x64xf32, #tpu.memory_space<vmem>>, %arg2: memref<8x20xf32, #tpu.memory_space<vmem>>, %arg3: memref<1x8x2xf32, #tpu.memory_space<vmem>>, %arg4: memref<20x128xf32, #tpu.memory_space<vmem>>) attributes {dimension_semantics = [#tpu.dimension_semantics<parallel>], iteration_bounds = array<i64: 1>, scalar_prefetch = 0 : i64, scratch_operands = 1 : i64, tpu.core_type = #tpu.core_type<tc>, window_params = [{transform_indices = @transform_0, window_bounds = array<i64: 2, 4, 64>}, {pipeline_mode = #tpu.pipeline_mode<synchronous>, transform_indices = @transform_1, window_bounds = array<i64: 8, 20>}, {transform_indices = @transform_2, window_bounds = array<i64: 1, 8, 2>}]} {
    %c0 = arith.constant 0 : index
    %c0_0 = arith.constant 0 : index
    %c0_1 = arith.constant 0 : index
    %0 = vector.load %arg1[%c0, %c0_0, %c0_1] : memref<2x4x64xf32, #tpu.memory_space<vmem>>, vector<1x4x64xf32>
    %1 = vector.shape_cast %0 : vector<1x4x64xf32> to vector<4x64xf32>
    %cst = arith.constant 0.000000e+00 : f32
    %2 = vector.broadcast %cst : f32 to vector<4x2xf32>
    %c0_2 = arith.constant 0 : index
    %c0_3 = arith.constant 0 : index
    %3 = vector.load %arg4[%c0_2, %c0_3] : memref<20x128xf32, #tpu.memory_space<vmem>>, vector<4x2xf32>
    tpu.vector_store %arg4[%c0_2, %c0_3], %2 {strides = array<i32>} : memref<20x128xf32, #tpu.memory_space<vmem>>, vector<4x2xf32>,
    %4 = vector.extract_strided_slice %1 {offsets = [0, 0], sizes = [4, 62], strides = [1, 1]} : vector<4x64xf32> to vector<4x62xf32>
    %c0_4 = arith.constant 0 : index
    %c2 = arith.constant 2 : index
    %5 = vector.load %arg4[%c0_4, %c2] : memref<20x128xf32, #tpu.memory_space<vmem>>, vector<4x62xf32>
    tpu.vector_store %arg4[%c0_4, %c2], %4 {strides = array<i32>} : memref<20x128xf32, #tpu.memory_space<vmem>>, vector<4x62xf32>,
    %cst_5 = arith.constant 0.000000e+00 : f32
    %6 = vector.broadcast %cst_5 : f32 to vector<4x1xf32>
    %c4 = arith.constant 4 : index
    %c0_6 = arith.constant 0 : index
    %7 = vector.load %arg4[%c4, %c0_6] : memref<20x128xf32, #tpu.memory_space<vmem>>, vector<4x1xf32>
    tpu.vector_store %arg4[%c4, %c0_6], %6 {strides = array<i32>} : memref<20x128xf32, #tpu.memory_space<vmem>>, vector<4x1xf32>,
    %8 = vector.extract_strided_slice %1 {offsets = [0, 0], sizes = [4, 63], strides = [1, 1]} : vector<4x64xf32> to vector<4x63xf32>
    %c4_7 = arith.constant 4 : index
    %c1 = arith.constant 1 : index
    %9 = vector.load %arg4[%c4_7, %c1] : memref<20x128xf32, #tpu.memory_space<vmem>>, vector<4x63xf32>
    tpu.vector_store %arg4[%c4_7, %c1], %8 {strides = array<i32>} : memref<20x128xf32, #tpu.memory_space<vmem>>, vector<4x63xf32>,
    %c8 = arith.constant 8 : index
    %c0_8 = arith.constant 0 : index
    %10 = vector.load %arg4[%c8, %c0_8] : memref<20x128xf32, #tpu.memory_space<vmem>>, vector<4x64xf32>
    tpu.vector_store %arg4[%c8, %c0_8], %1 {strides = array<i32>} : memref<20x128xf32, #tpu.memory_space<vmem>>, vector<4x64xf32>,
    %11 = vector.extract_strided_slice %1 {offsets = [0, 1], sizes = [4, 63], strides = [1, 1]} : vector<4x64xf32> to vector<4x63xf32>
    %c12 = arith.constant 12 : index
    %c0_9 = arith.constant 0 : index
    %12 = vector.load %arg4[%c12, %c0_9] : memref<20x128xf32, #tpu.memory_space<vmem>>, vector<4x63xf32>
    tpu.vector_store %arg4[%c12, %c0_9], %11 {strides = array<i32>} : memref<20x128xf32, #tpu.memory_space<vmem>>, vector<4x63xf32>,
    %cst_10 = arith.constant 0.000000e+00 : f32
    %13 = vector.broadcast %cst_10 : f32 to vector<4x1xf32>
    %c12_11 = arith.constant 12 : index
    %c63 = arith.constant 63 : index
    %14 = vector.load %arg4[%c12_11, %c63] : memref<20x128xf32, #tpu.memory_space<vmem>>, vector<4x1xf32>
    tpu.vector_store %arg4[%c12_11, %c63], %13 {strides = array<i32>} : memref<20x128xf32, #tpu.memory_space<vmem>>, vector<4x1xf32>,
    %15 = vector.extract_strided_slice %1 {offsets = [0, 2], sizes = [4, 62], strides = [1, 1]} : vector<4x64xf32> to vector<4x62xf32>
    %c16 = arith.constant 16 : index
    %c0_12 = arith.constant 0 : index
    %16 = vector.load %arg4[%c16, %c0_12] : memref<20x128xf32, #tpu.memory_space<vmem>>, vector<4x62xf32>
    tpu.vector_store %arg4[%c16, %c0_12], %15 {strides = array<i32>} : memref<20x128xf32, #tpu.memory_space<vmem>>, vector<4x62xf32>,
    %cst_13 = arith.constant 0.000000e+00 : f32
    %17 = vector.broadcast %cst_13 : f32 to vector<4x2xf32>
    %c16_14 = arith.constant 16 : index
    %c62 = arith.constant 62 : index
    %18 = vector.load %arg4[%c16_14, %c62] : memref<20x128xf32, #tpu.memory_space<vmem>>, vector<4x2xf32>
    tpu.vector_store %arg4[%c16_14, %c62], %17 {strides = array<i32>} : memref<20x128xf32, #tpu.memory_space<vmem>>, vector<4x2xf32>,
    %c1_15 = arith.constant 1 : index
    %c0_16 = arith.constant 0 : index
    %c0_17 = arith.constant 0 : index
    %19 = vector.load %arg1[%c1_15, %c0_16, %c0_17] : memref<2x4x64xf32, #tpu.memory_space<vmem>>, vector<1x4x64xf32>
    %20 = vector.shape_cast %19 : vector<1x4x64xf32> to vector<4x64xf32>
    %cst_18 = arith.constant 0.000000e+00 : f32
    %21 = vector.broadcast %cst_18 : f32 to vector<4x2xf32>
    %c0_19 = arith.constant 0 : index
    %c64 = arith.constant 64 : index
    %22 = vector.load %arg4[%c0_19, %c64] : memref<20x128xf32, #tpu.memory_space<vmem>>, vector<4x2xf32>
    tpu.vector_store %arg4[%c0_19, %c64], %21 {strides = array<i32>} : memref<20x128xf32, #tpu.memory_space<vmem>>, vector<4x2xf32>,
    %23 = vector.extract_strided_slice %20 {offsets = [0, 0], sizes = [4, 62], strides = [1, 1]} : vector<4x64xf32> to vector<4x62xf32>
    %c0_20 = arith.constant 0 : index
    %c66 = arith.constant 66 : index
    %24 = vector.load %arg4[%c0_20, %c66] : memref<20x128xf32, #tpu.memory_space<vmem>>, vector<4x62xf32>
    tpu.vector_store %arg4[%c0_20, %c66], %23 {strides = array<i32>} : memref<20x128xf32, #tpu.memory_space<vmem>>, vector<4x62xf32>,
    %cst_21 = arith.constant 0.000000e+00 : f32
    %25 = vector.broadcast %cst_21 : f32 to vector<4x1xf32>
    %c4_22 = arith.constant 4 : index
    %c64_23 = arith.constant 64 : index
    %26 = vector.load %arg4[%c4_22, %c64_23] : memref<20x128xf32, #tpu.memory_space<vmem>>, vector<4x1xf32>
    tpu.vector_store %arg4[%c4_22, %c64_23], %25 {strides = array<i32>} : memref<20x128xf32, #tpu.memory_space<vmem>>, vector<4x1xf32>,
    %27 = vector.extract_strided_slice %20 {offsets = [0, 0], sizes = [4, 63], strides = [1, 1]} : vector<4x64xf32> to vector<4x63xf32>
    %c4_24 = arith.constant 4 : index
    %c65 = arith.constant 65 : index
    %28 = vector.load %arg4[%c4_24, %c65] : memref<20x128xf32, #tpu.memory_space<vmem>>, vector<4x63xf32>
    tpu.vector_store %arg4[%c4_24, %c65], %27 {strides = array<i32>} : memref<20x128xf32, #tpu.memory_space<vmem>>, vector<4x63xf32>,
    %c8_25 = arith.constant 8 : index
    %c64_26 = arith.constant 64 : index
    %29 = vector.load %arg4[%c8_25, %c64_26] : memref<20x128xf32, #tpu.memory_space<vmem>>, vector<4x64xf32>
    tpu.vector_store %arg4[%c8_25, %c64_26], %20 {strides = array<i32>} : memref<20x128xf32, #tpu.memory_space<vmem>>, vector<4x64xf32>,
    %30 = vector.extract_strided_slice %20 {offsets = [0, 1], sizes = [4, 63], strides = [1, 1]} : vector<4x64xf32> to vector<4x63xf32>
    %c12_27 = arith.constant 12 : index
    %c64_28 = arith.constant 64 : index
    %31 = vector.load %arg4[%c12_27, %c64_28] : memref<20x128xf32, #tpu.memory_space<vmem>>, vector<4x63xf32>
    tpu.vector_store %arg4[%c12_27, %c64_28], %30 {strides = array<i32>} : memref<20x128xf32, #tpu.memory_space<vmem>>, vector<4x63xf32>,
    %cst_29 = arith.constant 0.000000e+00 : f32
    %32 = vector.broadcast %cst_29 : f32 to vector<4x1xf32>
    %c12_30 = arith.constant 12 : index
    %c127 = arith.constant 127 : index
    %33 = vector.load %arg4[%c12_30, %c127] : memref<20x128xf32, #tpu.memory_space<vmem>>, vector<4x1xf32>
    tpu.vector_store %arg4[%c12_30, %c127], %32 {strides = array<i32>} : memref<20x128xf32, #tpu.memory_space<vmem>>, vector<4x1xf32>,
    %34 = vector.extract_strided_slice %20 {offsets = [0, 2], sizes = [4, 62], strides = [1, 1]} : vector<4x64xf32> to vector<4x62xf32>
    %c16_31 = arith.constant 16 : index
    %c64_32 = arith.constant 64 : index
    %35 = vector.load %arg4[%c16_31, %c64_32] : memref<20x128xf32, #tpu.memory_space<vmem>>, vector<4x62xf32>
    tpu.vector_store %arg4[%c16_31, %c64_32], %34 {strides = array<i32>} : memref<20x128xf32, #tpu.memory_space<vmem>>, vector<4x62xf32>,
    %cst_33 = arith.constant 0.000000e+00 : f32
    %36 = vector.broadcast %cst_33 : f32 to vector<4x2xf32>
    %c16_34 = arith.constant 16 : index
    %c126 = arith.constant 126 : index
    %37 = vector.load %arg4[%c16_34, %c126] : memref<20x128xf32, #tpu.memory_space<vmem>>, vector<4x2xf32>
    tpu.vector_store %arg4[%c16_34, %c126], %36 {strides = array<i32>} : memref<20x128xf32, #tpu.memory_space<vmem>>, vector<4x2xf32>,
    %c0_35 = arith.constant 0 : index
    %c0_36 = arith.constant 0 : index
    %38 = vector.load %arg2[%c0_35, %c0_36] : memref<8x20xf32, #tpu.memory_space<vmem>>, vector<8x20xf32>
    %c0_37 = arith.constant 0 : index
    %c0_38 = arith.constant 0 : index
    %39 = vector.load %arg4[%c0_37, %c0_38] : memref<20x128xf32, #tpu.memory_space<vmem>>, vector<20x128xf32>
    %cst_39 = arith.constant dense<0.000000e+00> : vector<8x128xf32>
    %40 = tpu.matmul %38, %39, %cst_39 {dimension_numbers = #tpu.dot_dimension_numbers<[1], [0], [0], [1], [0, 0, 1, 1], [], []>} : vector<8x20xf32>, vector<20x128xf32>, vector<8x128xf32> -> vector<8x128xf32>
    %cst_40 = arith.constant dense<0.000000e+00> : vector<8xf32>
    %41 = vector.multi_reduction <add>, %40, %cst_40 [1] : vector<8x128xf32> to vector<8xf32>
    %42 = vector.shape_cast %41 : vector<8xf32> to vector<8x1xf32>
    %43 = arith.mulf %40, %40 : vector<8x128xf32>
    %cst_41 = arith.constant dense<0.000000e+00> : vector<8xf32>
    %44 = vector.multi_reduction <add>, %43, %cst_41 [1] : vector<8x128xf32> to vector<8xf32>
    %45 = vector.shape_cast %44 : vector<8xf32> to vector<8x1xf32>
    %46 = tpu.concatenate %42, %45 in 1 : vector<8x1xf32>, vector<8x1xf32> -> vector<8x2xf32>
    %c0_42 = arith.constant 0 : index
    %c0_43 = arith.constant 0 : index
    %c0_44 = arith.constant 0 : index
    %47 = vector.load %arg3[%c0_42, %c0_43, %c0_44] : memref<1x8x2xf32, #tpu.memory_space<vmem>>, vector<1x8x2xf32>
    %48 = vector.shape_cast %47 : vector<1x8x2xf32> to vector<8x2xf32>
    %49 = vector.shape_cast %46 : vector<8x2xf32> to vector<1x8x2xf32>
    tpu.vector_store %arg3[%c0_42, %c0_43, %c0_44], %49 {strides = array<i32>} : memref<1x8x2xf32, #tpu.memory_space<vmem>>, vector<1x8x2xf32>,
    return
  }
  func.func @transform_0(%arg0: i32) -> (i32, i32, i32) {
    %c0_i32 = arith.constant 0 : i32
    %c0_i32_0 = arith.constant 0 : i32
    %c0_i32_1 = arith.constant 0 : i32
    return %arg0, %c0_i32, %c0_i32_0 : i32, i32, i32
  }
  func.func @transform_1(%arg0: i32) -> (i32, i32) {
    %c0_i32 = arith.constant 0 : i32
    %c0_i32_0 = arith.constant 0 : i32
    %c0_i32_1 = arith.constant 0 : i32
    return %c0_i32, %c0_i32_0 : i32, i32
  }
  func.func @transform_2(%arg0: i32) -> (i32, i32, i32) {
    %c0_i32 = arith.constant 0 : i32
    %c0_i32_0 = arith.constant 0 : i32
    %c0_i32_1 = arith.constant 0 : i32
    return %arg0, %c0_i32, %c0_i32_0 : i32, i32, i32
  }
}

</mosaic_0001>

<bundles_post_ra>
// kernel: tpu_custom_call.1
= control target key start
LH: loop header
LB: loop body
LE: loop exit
PB: predicated region body
PF: predicated region fallthrough
CT: control target
= control target key end

     0   :  { %7 = vsyncpa [#allocation4], 0  ;;  %s328_s0 = inlined_call_operand.hbm [shape: f32[2,4,64], index: 0, kind: input, shape index: {}]   ;;  %s329_s1 = inlined_call_operand.hbm [shape: f32[8,20], index: 1, kind: input, shape index: {}]   ;;  %s330_s2 = inlined_call_operand.vmem [shape: f32[1,8,2], index: 2, kind: output, shape index: {}]  }
   0x1   :  { %8 = vsyncpa [#allocation6], 0  ;;  %s275_s9 = smov [#allocation3]  }
   0x2   :  { %s14_s10 = sshll.u32 %s275_s9, 4  ;;  %s15_s10 = int_to_ptr.vmem [resolvable:$true] %s14_s10 }
   0x3   :  { %s239_s11 = scalar_lea.vmem %s15_s10, 128  ;;  %p244_p1 = scmp.lt.s32.totalorder %s15_s10, %s15_s10 }
   0x4   :  { %p240_p0 = scmp.ne.s32.totalorder %s15_s10, %s239_s11  ;;  %p245_p2 = scmp.lt.s32.totalorder %s239_s11, %s239_s11 }
   0x6   :  { %p246_p3 = por %p245_p2, %p244_p1 }
   0x8   :  { %p247_p4 = pnand %p246_p3, %p240_p0 }
   0xa   :  { %250 = shalt.err (!%p247_p4)
}
   0xb   :  { %s276_s12 = smov 64   ;;  %s277_s13 = smov 4  }
   0xc   :  { %20 = dma.hbm_to_vmem [thread:$0]  %s328_s0, 128, %s15_s10, [#allocation4], %s276_s12, %s276_s12, %s277_s13  }
   0xd   :  { %s278_s16 = smov [#allocation5]  }
   0xe   :  { %s27_s17 = sshll.u32 %s278_s16, 4  ;;  %s28_s17 = int_to_ptr.vmem [resolvable:$true] %s27_s17 }
   0xf   :  { %s259_s18 = scalar_lea.vmem %s28_s17, 128  ;;  %p264_p6 = scmp.lt.s32.totalorder %s28_s17, %s28_s17 }
  0x10   :  { %p260_p5 = scmp.ne.s32.totalorder %s28_s17, %s259_s18  ;;  %p265_p7 = scmp.lt.s32.totalorder %s259_s18, %s259_s18 }
  0x12   :  { %p266_p8 = por %p265_p7, %p264_p6 }
  0x14   :  { %p267_p9 = pnand %p266_p8, %p260_p5 }
  0x16   :  { %270 = shalt.err (!%p267_p9)
}
  0x17   :  { %30 = dma.hbm_to_vmem [thread:$0]  %s329_s1, 128, %s28_s17, [#allocation6]  }
  0x18   :  { %271 = dma.done.wait [#allocation4], 128  }
  0x19   :  { %272 = vsyncadd [#allocation4], 4294967168 }
  0x1a   :  { %273 = dma.done.wait [#allocation6], 128  }
  0x1b   :  { %274 = vsyncadd [#allocation6], 4294967168  ;;  %v279_v0 = vmov 0.0   ;;  %vm38_vm0 = vcmask 11264   ;;  %vm46_vm1 = vcmask 3072   ;;  %vm53_vm2 = vcmask 519168  }
  0x1c   :  { %208 = vmatprep.subr.mxu0 %v279_v0  ;;  %39 = vst.msk [vmem:[#allocation2] sm:$0xf] %vm38_vm0, %v279_v0  ;;  %v37_v1 = vld [vmem:[#allocation3] sm:$0xf]  ;;  %v70_v2 = vld [vmem:[#allocation3 + $0x4] sm:$0xf] }
  0x1d   :  { %47 = vst.msk [vmem:[#allocation2 + $0x4] sm:$0xf] %vm46_vm1, %v279_v0  ;;  %s280_s0 = smov 126   ;;  %s281_s21 = smov 62   ;;  %vm286_vm3 = vmmov 0   ;;  %vm65_vm4 = vcmask 502784  }
  0x1e   :  { %62 = vrot.lane.b32.xlu0 %v37_v1, %s280_s0  ;;  %98 = vrot.lane.b32.xlu1 %v70_v2, %s281_s21  ;;  %54 = vst.msk [vmem:[#allocation2 + $0x8] sm:$0xf] %vm53_vm2, %v37_v1  ;;  %s282_s1 = smov 127   ;;  %s283_s22 = smov 63   ;;  %vm67_vm5 = vcmask 519664   ;;  %vm101_vm6 = vcmask 1027584  }
  0x1f   :  { %s284_s23 = smov 2   ;;  %s285_s24 = smov 1   ;;  %214 = vmatprep.mubr.msk.f32.mxu0 %vm286_vm3, %v279_v0  ;;  %vm103_vm7 = vcmask 1044464   ;;  %vm58_vm8 = vcmask 510976   ;;  %vm60_vm9 = vcmask 519672   ;;  %vm94_vm10 = vcmask 1035776  }
  0x20   :  { %s287_s25 = smov 66   ;;  %s288_s26 = smov 65   ;;  %vm96_vm11 = vcmask 1044472   ;;  %vm44_vm12 = vcmask 519184   ;;  %vm51_vm13 = vcmask 519176   ;;  %vm71_vm14 = vcmask 536064  }
  0x21   :  { %vm79_vm15 = vcmask 527872   ;;  %vm113_vm0 = vcmask 1043456   ;;  %vm89_vm1 = vcmask 1043968   ;;  %vm77_vm2 = vcmask 1043984   ;;  %v105_v14 = vld [vmem:[#allocation5] sm:$0xff] }
  0x22   :  { %55 = vrot.lane.b32.xlu0 %v37_v1, %s282_s1  ;;  %91 = vrot.lane.b32.xlu1 %v70_v2, %s283_s22  ;;  %vm84_vm3 = vcmask 1043976  }
  0x26   :  { %41 = vrot.lane.b32.xlu0 %v37_v1, %s284_s23  ;;  %48 = vrot.lane.b32.xlu1 %v37_v1, %s285_s24 }
  0x2a   :  { %86 = vrot.lane.b32.xlu0 %v70_v2, %s276_s12  ;;  %74 = vrot.lane.b32.xlu1 %v70_v2, %s287_s25 }
  0x2e   :  { %81 = vrot.lane.b32.xlu0 %v70_v2, %s288_s26 }
  0x90   :  { %v63_v3 = vpop.permute.xlu0 %62  ;;  %v99_v4 = vpop.permute.xlu1 %98 }
  0x91   :  { %66 = vst.msk [vmem:[#allocation2 + $0x10] sm:$0xf] %vm65_vm4, %v63_v3  ;;  %vm109_vm4 = vcmask 162816  }
  0x92   :  { %68 = vst.msk [vmem:[#allocation2 + $0x10] sm:$0xf] %vm67_vm5, %v279_v0  ;;  %vm192_vm5 = vcmask 7168  }
  0x93   :  { %102 = vst.msk [vmem:[#allocation2 + $0x10] sm:$0xf] %vm101_vm6, %v99_v4  ;;  %vm194_vm6 = vcmask 15360  }
  0x94   :  { %104 = vst.msk [vmem:[#allocation2 + $0x10] sm:$0xf] %vm103_vm7, %v279_v0  ;;  %v56_v5 = vpop.permute.xlu0 %55  ;;  %v92_v6 = vpop.permute.xlu1 %91 }
  0x95   :  { %59 = vst.msk [vmem:[#allocation2 + $0xc] sm:$0xf] %vm58_vm8, %v56_v5 }
  0x96   :  { %61 = vst.msk [vmem:[#allocation2 + $0xc] sm:$0xf] %vm60_vm9, %v279_v0 }
  0x97   :  { %95 = vst.msk [vmem:[#allocation2 + $0xc] sm:$0xf] %vm94_vm10, %v92_v6 }
  0x98   :  { %97 = vst.msk [vmem:[#allocation2 + $0xc] sm:$0xf] %vm96_vm11, %v279_v0  ;;  %v42_v7 = vpop.permute.xlu0 %41  ;;  %v49_v8 = vpop.permute.xlu1 %48 }
  0x99   :  { %45 = vst.msk [vmem:[#allocation2] sm:$0xf] %vm44_vm12, %v42_v7 }
  0x9a   :  { %52 = vst.msk [vmem:[#allocation2 + $0x4] sm:$0xf] %vm51_vm13, %v49_v8 }
  0x9b   :  { %72 = vst.msk [vmem:[#allocation2] sm:$0xf] %vm71_vm14, %v279_v0  ;;  %v108_v9 = vld [vmem:[#allocation2 + $0x10] sm:$0xf] }
  0x9c   :  { %80 = vst.msk [vmem:[#allocation2 + $0x4] sm:$0xf] %vm79_vm15, %v279_v0  ;;  %v87_v10 = vpop.permute.xlu0 %86  ;;  %v75_v11 = vpop.permute.xlu1 %74  ;;  %209 = vmatpush3.msk.msra.mxu0 %vm113_vm0, %v108_v9 }
  0x9d   :  { %90 = vst.msk [vmem:[#allocation2 + $0x8] sm:$0xf] %vm89_vm1, %v87_v10  ;;  %210 = vmatprep.subr.mxu0 %v279_v0 }
  0x9e   :  { %78 = vst.msk [vmem:[#allocation2] sm:$0xf] %vm77_vm2, %v75_v11 }
  0xa0   :  { %v82_v12 = vpop.permute.xlu0 %81 }
  0xa1   :  { %85 = vst.msk [vmem:[#allocation2 + $0x4] sm:$0xf] %vm84_vm3, %v82_v12 }
  0xa4   :  { %v107_v13 = vld [vmem:[#allocation2 + $0x8] sm:$0xff] }
  0xa5   :  { %211 = vmatpush3.msra.mxu0 %v107_v13 }
  0xa6   :  { %212 = vmatprep.subr.mxu0 %v279_v0 }
  0xa8   :  { %v106_v15 = vld [vmem:[#allocation2] sm:$0xff] }
  0xa9   :  { %213 = vmatpush3.msra.mxu0 %v106_v15 }
  0xaa   :  { %215 = vmatmul.mubr.msk.f32.vlgmr.msra.gmra.mxu0 %vm109_vm4, %v105_v14 }
 0x16a   :  { %v183_v16 = vpop.f32.mrf.mxu0 }
 0x16b   :  { %187 = vadd.xlane.f32.xlu1 %v183_v16  ;;  %v189_v17 = vmul.f32 %v183_v16, %v183_v16 }
 0x16c   :  { %v216_v18 = vpop.f32.mrf.mxu0 }
 0x16d   :  { %190 = vadd.xlane.f32.xlu0 %v189_v17 }
 0x1f4   :  { %v188_v19 = vpop.xlane.xlu1 %187 }
 0x1f6   :  { %v191_v20 = vpop.xlane.xlu0 %190 }
 0x1f7   :  { %v193_v21 = vsel %vm192_vm5, %v188_v19, %v191_v20 }
 0x1f8   :  { %195 = vst.msk [vmem:[%s330_s2] sm:$0xff] %vm194_vm6, %v193_v21 }
 0x1f9   :  { %200 = vsyncpa [#allocation4], 1 }
 0x1fa   :  { %201 = vsyncpa [#allocation6], 1 }

</bundles_post_ra>
